<compile_context>
chip_gen: v5e
topology: v5e:2x2
jax: 0.10.0
libtpu: 0.0.40
codegen_flags: <defaults>
</compile_context>

<pallas_src>
import functools
import math

import jax
import jax.numpy as jnp
from jax import lax
from jax.experimental import pallas as pl
from jax.experimental.pallas import tpu as pltpu


# ----------------------------------------------------------------------------
# Fused kernel: one batch element per grid step
# ----------------------------------------------------------------------------
def _fused_mhca_kernel(x_ref, y_ref, w_ref, b_ref, g_ref, beta_ref, o_ref,
                       *, num_heads, head_size):
    f32 = jnp.float32
    x = x_ref[0]                        # (Sq, E)
    y = y_ref[0]                        # (Sk, E)
    w = w_ref[...]                      # (E, E)  PyTorch Linear layout (out, in)
    b = b_ref[...].astype(f32)          # (1, E)
    gamma = g_ref[...].astype(f32)      # (1, E)
    beta = beta_ref[...].astype(f32)    # (1, E)

    def layer_norm(z):
        zf = z.astype(f32)
        mu = jnp.mean(zf, axis=-1, keepdims=True)
        var = jnp.mean((zf - mu) ** 2, axis=-1, keepdims=True)
        return (zf - mu) * lax.rsqrt(var + 1e-5) * gamma + beta

    # LN stats in f32; matmul operands in the weight dtype, f32 accumulation.
    xn = layer_norm(x).astype(w.dtype)
    yn = layer_norm(y).astype(w.dtype)

    # Linear: z @ W^T + b  == dot_general contracting last dim of z with the
    # 'in' (last) dim of W -> no explicit transpose anywhere.
    dn_nt = (((1,), (1,)), ((), ()))
    q = lax.dot_general(xn, w, dn_nt, preferred_element_type=f32) + b    # (Sq, E)
    kv = lax.dot_general(yn, w, dn_nt, preferred_element_type=f32) + b   # (Sk, E)

    scale = 1.0 / math.sqrt(head_size)

    # Static (unrolled) head loop; heads live along the lane dim of q/kv so the
    # slices are static lane slices and the merged output is written once,
    # lane-dense, as (Sq, E).
    head_outs = []
    for h in range(num_heads):
        lo = h * head_size
        hi = lo + head_size
        q_h = q[:, lo:hi]               # (Sq, d)
        kv_h = kv[:, lo:hi]             # (Sk, d)

        # QK^T: contract the d axis of both operands (no k.T).
        s = lax.dot_general(q_h, kv_h, dn_nt,
                            preferred_element_type=f32) * scale          # (Sq, Sk)
        m = jnp.max(s, axis=-1, keepdims=True)
        p = jnp.exp(s - m)
        denom = jnp.sum(p, axis=-1, keepdims=True)
        p = p / denom                     # exact softmax normalization
        o_h = jnp.dot(p, kv_h, preferred_element_type=f32)               # (Sq, d)
        head_outs.append(o_h)

    out = jnp.concatenate(head_outs, axis=-1)                            # (Sq, E)
    o_ref[0] = out.astype(o_ref.dtype)


# ----------------------------------------------------------------------------
# Wrapper
# ----------------------------------------------------------------------------
def multihead_cross_attention(x, y, params, embed_dim, head_size):
    b, sq, e = x.shape
    _, sk, _ = y.shape
    assert e == embed_dim and embed_dim % head_size == 0
    num_heads = embed_dim // head_size

    w = params["w"]                      # (E, E) PyTorch (out_features, in_features)
    bias = params["b"].reshape(1, e)
    gamma = params["gamma"].reshape(1, e)
    beta = params["beta"].reshape(1, e)

    kernel = functools.partial(_fused_mhca_kernel,
                               num_heads=num_heads, head_size=head_size)

    return pl.pallas_call(
        kernel,
        out_shape=jax.ShapeDtypeStruct((b, sq, e), x.dtype),
        grid_spec=pltpu.PrefetchScalarGridSpec(
            num_scalar_prefetch=0,
            grid=(b,),
            in_specs=[
                pl.BlockSpec((1, sq, e), lambda i: (i, 0, 0)),   # x   (per batch)
                pl.BlockSpec((1, sk, e), lambda i: (i, 0, 0)),   # y   (per batch)
                # Params: same block index every step -> VMEM-resident, one DMA.
                pl.BlockSpec((e, e), lambda i: (0, 0)),          # W
                pl.BlockSpec((1, e), lambda i: (0, 0)),          # b
                pl.BlockSpec((1, e), lambda i: (0, 0)),          # gamma
                pl.BlockSpec((1, e), lambda i: (0, 0)),          # beta
            ],
            out_specs=pl.BlockSpec((1, sq, e), lambda i: (i, 0, 0)),
        ),
        compiler_params=pltpu.CompilerParams(
            dimension_semantics=("parallel",)),
    )(x, y, w, bias, gamma, beta)


# ----------------------------------------------------------------------------
# Pure-JAX reference for verification
# ----------------------------------------------------------------------------
def reference(x, y, params, embed_dim, head_size):
    def ln(z):
        mu = jnp.mean(z, -1, keepdims=True)
        var = jnp.mean((z - mu) ** 2, -1, keepdims=True)
        return (z - mu) / jnp.sqrt(var + 1e-5) * params["gamma"] + params["beta"]

    b, sq, e = x.shape
    _, sk, _ = y.shape
    h = embed_dim // head_size
    q = ln(x) @ params["w"].T + params["b"]
    kv = ln(y) @ params["w"].T + params["b"]
    q = q.reshape(b, sq, h, head_size).transpose(0, 2, 1, 3)
    kv = kv.reshape(b, sk, h, head_size).transpose(0, 2, 1, 3)
    s = jnp.einsum("bhqd,bhkd->bhqk", q, kv) / math.sqrt(head_size)
    p = jax.nn.softmax(s, axis=-1)
    o = jnp.einsum("bhqk,bhkd->bhqd", p, kv)
    return o.transpose(0, 2, 1, 3).reshape(b, sq, e)


if __name__ == "__main__":
    embed_dim = 32
    head_size = 8          # -> 4 heads
    B, Sq, Sk = 2, 16, 8

    key = jax.random.PRNGKey(0)
    kx, ky, kw, kb = jax.random.split(key, 4)

    x = jax.random.normal(kx, (B, Sq, embed_dim), dtype=jnp.float32)
    y = jax.random.normal(ky, (B, Sk, embed_dim), dtype=jnp.float32)

    # Deterministic parameter init (LayerNorm default gamma=1, beta=0;
    # Linear weight/bias: small random, deterministic).
    params = {
        "gamma": jnp.ones((embed_dim,), jnp.float32),
        "beta": jnp.zeros((embed_dim,), jnp.float32),
        "w": jax.random.normal(kw, (embed_dim, embed_dim), jnp.float32) * 0.1,
        "b": jax.random.normal(kb, (embed_dim,), jnp.float32) * 0.1,
    }

    out = multihead_cross_attention(x, y, params, embed_dim, head_size)
    out = jax.block_until_ready(out)

    ref = reference(x, y, params, embed_dim, head_size)
    assert out.shape == (B, Sq, embed_dim)
    assert jnp.allclose(out, ref, atol=1e-3, rtol=1e-3), "mismatch vs reference"

    print("KERNEL_OK")
</pallas_src>

<mosaic_0001>
module attributes {stable_mosaic.version = 11 : i64} {
  func.func @_fused_mhca_kernel(%arg0: i32, %arg1: memref<1x16x32xf32, #tpu.memory_space<vmem>>, %arg2: memref<1x8x32xf32, #tpu.memory_space<vmem>>, %arg3: memref<32x32xf32, #tpu.memory_space<vmem>>, %arg4: memref<1x32xf32, #tpu.memory_space<vmem>>, %arg5: memref<1x32xf32, #tpu.memory_space<vmem>>, %arg6: memref<1x32xf32, #tpu.memory_space<vmem>>, %arg7: memref<1x16x32xf32, #tpu.memory_space<vmem>>) attributes {dimension_semantics = [#tpu.dimension_semantics<parallel>], iteration_bounds = array<i64: 2>, scalar_prefetch = 0 : i64, scratch_operands = 0 : i64, tpu.core_type = #tpu.core_type<tc>, window_params = [{transform_indices = @transform_0, window_bounds = array<i64: 1, 16, 32>}, {transform_indices = @transform_1, window_bounds = array<i64: 1, 8, 32>}, {pipeline_mode = #tpu.pipeline_mode<synchronous>, transform_indices = @transform_2, window_bounds = array<i64: 32, 32>}, {pipeline_mode = #tpu.pipeline_mode<synchronous>, transform_indices = @transform_3, window_bounds = array<i64: 1, 32>}, {pipeline_mode = #tpu.pipeline_mode<synchronous>, transform_indices = @transform_4, window_bounds = array<i64: 1, 32>}, {pipeline_mode = #tpu.pipeline_mode<synchronous>, transform_indices = @transform_5, window_bounds = array<i64: 1, 32>}, {transform_indices = @transform_6, window_bounds = array<i64: 1, 16, 32>}]} {
    %c0 = arith.constant 0 : index
    %c0_0 = arith.constant 0 : index
    %c0_1 = arith.constant 0 : index
    %0 = vector.load %arg1[%c0, %c0_0, %c0_1] : memref<1x16x32xf32, #tpu.memory_space<vmem>>, vector<1x16x32xf32>
    %1 = vector.shape_cast %0 : vector<1x16x32xf32> to vector<16x32xf32>
    %c0_2 = arith.constant 0 : index
    %c0_3 = arith.constant 0 : index
    %c0_4 = arith.constant 0 : index
    %2 = vector.load %arg2[%c0_2, %c0_3, %c0_4] : memref<1x8x32xf32, #tpu.memory_space<vmem>>, vector<1x8x32xf32>
    %3 = vector.shape_cast %2 : vector<1x8x32xf32> to vector<8x32xf32>
    %c0_5 = arith.constant 0 : index
    %c0_6 = arith.constant 0 : index
    %4 = vector.load %arg3[%c0_5, %c0_6] : memref<32x32xf32, #tpu.memory_space<vmem>>, vector<32x32xf32>
    %c0_7 = arith.constant 0 : index
    %c0_8 = arith.constant 0 : index
    %5 = vector.load %arg4[%c0_7, %c0_8] : memref<1x32xf32, #tpu.memory_space<vmem>>, vector<1x32xf32>
    %c0_9 = arith.constant 0 : index
    %c0_10 = arith.constant 0 : index
    %6 = vector.load %arg5[%c0_9, %c0_10] : memref<1x32xf32, #tpu.memory_space<vmem>>, vector<1x32xf32>
    %c0_11 = arith.constant 0 : index
    %c0_12 = arith.constant 0 : index
    %7 = vector.load %arg6[%c0_11, %c0_12] : memref<1x32xf32, #tpu.memory_space<vmem>>, vector<1x32xf32>
    %cst = arith.constant dense<0.000000e+00> : vector<16xf32>
    %8 = vector.multi_reduction <add>, %1, %cst [1] : vector<16x32xf32> to vector<16xf32>
    %9 = vector.shape_cast %8 : vector<16xf32> to vector<16x1xf32>
    %cst_13 = arith.constant 3.200000e+01 : f32
    %10 = vector.broadcast %cst_13 : f32 to vector<16x1xf32>
    %11 = arith.divf %9, %10 : vector<16x1xf32>
    %12 = vector.broadcast %11 : vector<16x1xf32> to vector<16x32xf32>
    %13 = arith.subf %1, %12 : vector<16x32xf32>
    %14 = arith.mulf %13, %13 : vector<16x32xf32>
    %cst_14 = arith.constant dense<0.000000e+00> : vector<16xf32>
    %15 = vector.multi_reduction <add>, %14, %cst_14 [1] : vector<16x32xf32> to vector<16xf32>
    %16 = vector.shape_cast %15 : vector<16xf32> to vector<16x1xf32>
    %cst_15 = arith.constant 3.200000e+01 : f32
    %17 = vector.broadcast %cst_15 : f32 to vector<16x1xf32>
    %18 = arith.divf %16, %17 : vector<16x1xf32>
    %19 = vector.broadcast %11 : vector<16x1xf32> to vector<16x32xf32>
    %20 = arith.subf %1, %19 : vector<16x32xf32>
    %cst_16 = arith.constant 9.99999974E-6 : f32
    %21 = vector.broadcast %cst_16 : f32 to vector<16x1xf32>
    %22 = arith.addf %18, %21 : vector<16x1xf32>
    %23 = math.rsqrt %22 : vector<16x1xf32>
    %24 = vector.broadcast %23 : vector<16x1xf32> to vector<16x32xf32>
    %25 = arith.mulf %20, %24 : vector<16x32xf32>
    %26 = vector.broadcast %6 : vector<1x32xf32> to vector<16x32xf32>
    %27 = arith.mulf %25, %26 : vector<16x32xf32>
    %28 = vector.broadcast %7 : vector<1x32xf32> to vector<16x32xf32>
    %29 = arith.addf %27, %28 : vector<16x32xf32>
    %cst_17 = arith.constant dense<0.000000e+00> : vector<8xf32>
    %30 = vector.multi_reduction <add>, %3, %cst_17 [1] : vector<8x32xf32> to vector<8xf32>
    %31 = vector.shape_cast %30 : vector<8xf32> to vector<8x1xf32>
    %cst_18 = arith.constant 3.200000e+01 : f32
    %32 = vector.broadcast %cst_18 : f32 to vector<8x1xf32>
    %33 = arith.divf %31, %32 : vector<8x1xf32>
    %34 = vector.broadcast %33 : vector<8x1xf32> to vector<8x32xf32>
    %35 = arith.subf %3, %34 : vector<8x32xf32>
    %36 = arith.mulf %35, %35 : vector<8x32xf32>
    %cst_19 = arith.constant dense<0.000000e+00> : vector<8xf32>
    %37 = vector.multi_reduction <add>, %36, %cst_19 [1] : vector<8x32xf32> to vector<8xf32>
    %38 = vector.shape_cast %37 : vector<8xf32> to vector<8x1xf32>
    %cst_20 = arith.constant 3.200000e+01 : f32
    %39 = vector.broadcast %cst_20 : f32 to vector<8x1xf32>
    %40 = arith.divf %38, %39 : vector<8x1xf32>
    %41 = vector.broadcast %33 : vector<8x1xf32> to vector<8x32xf32>
    %42 = arith.subf %3, %41 : vector<8x32xf32>
    %cst_21 = arith.constant 9.99999974E-6 : f32
    %43 = vector.broadcast %cst_21 : f32 to vector<8x1xf32>
    %44 = arith.addf %40, %43 : vector<8x1xf32>
    %45 = math.rsqrt %44 : vector<8x1xf32>
    %46 = vector.broadcast %45 : vector<8x1xf32> to vector<8x32xf32>
    %47 = arith.mulf %42, %46 : vector<8x32xf32>
    %48 = vector.broadcast %6 : vector<1x32xf32> to vector<8x32xf32>
    %49 = arith.mulf %47, %48 : vector<8x32xf32>
    %50 = vector.broadcast %7 : vector<1x32xf32> to vector<8x32xf32>
    %51 = arith.addf %49, %50 : vector<8x32xf32>
    %cst_22 = arith.constant dense<0.000000e+00> : vector<16x32xf32>
    %52 = tpu.matmul %29, %4, %cst_22 {dimension_numbers = #tpu.dot_dimension_numbers<[1], [1], [0], [0], [0, 0, 1, 0], [], []>} : vector<16x32xf32>, vector<32x32xf32>, vector<16x32xf32> -> vector<16x32xf32>
    %53 = vector.broadcast %5 : vector<1x32xf32> to vector<16x32xf32>
    %54 = arith.addf %52, %53 : vector<16x32xf32>
    %cst_23 = arith.constant dense<0.000000e+00> : vector<8x32xf32>
    %55 = tpu.matmul %51, %4, %cst_23 {dimension_numbers = #tpu.dot_dimension_numbers<[1], [1], [0], [0], [0, 0, 1, 0], [], []>} : vector<8x32xf32>, vector<32x32xf32>, vector<8x32xf32> -> vector<8x32xf32>
    %56 = vector.broadcast %5 : vector<1x32xf32> to vector<8x32xf32>
    %57 = arith.addf %55, %56 : vector<8x32xf32>
    %58 = vector.extract_strided_slice %54 {offsets = [0, 0], sizes = [16, 8], strides = [1, 1]} : vector<16x32xf32> to vector<16x8xf32>
    %59 = vector.extract_strided_slice %57 {offsets = [0, 0], sizes = [8, 8], strides = [1, 1]} : vector<8x32xf32> to vector<8x8xf32>
    %cst_24 = arith.constant dense<0.000000e+00> : vector<16x8xf32>
    %60 = tpu.matmul %58, %59, %cst_24 {dimension_numbers = #tpu.dot_dimension_numbers<[1], [1], [0], [0], [0, 0, 1, 0], [], []>} : vector<16x8xf32>, vector<8x8xf32>, vector<16x8xf32> -> vector<16x8xf32>
    %cst_25 = arith.constant 0.353553385 : f32
    %61 = vector.broadcast %cst_25 : f32 to vector<16x8xf32>
    %62 = arith.mulf %60, %61 : vector<16x8xf32>
    %cst_26 = arith.constant dense<0xFF800000> : vector<16xf32>
    %63 = vector.multi_reduction <maximumf>, %62, %cst_26 [1] : vector<16x8xf32> to vector<16xf32>
    %64 = vector.shape_cast %63 : vector<16xf32> to vector<16x1xf32>
    %65 = vector.broadcast %64 : vector<16x1xf32> to vector<16x8xf32>
    %66 = arith.subf %62, %65 : vector<16x8xf32>
    %67 = math.exp %66 : vector<16x8xf32>
    %cst_27 = arith.constant dense<0.000000e+00> : vector<16xf32>
    %68 = vector.multi_reduction <add>, %67, %cst_27 [1] : vector<16x8xf32> to vector<16xf32>
    %69 = vector.shape_cast %68 : vector<16xf32> to vector<16x1xf32>
    %70 = vector.broadcast %69 : vector<16x1xf32> to vector<16x8xf32>
    %71 = arith.divf %67, %70 : vector<16x8xf32>
    %cst_28 = arith.constant dense<0.000000e+00> : vector<16x8xf32>
    %72 = tpu.matmul %71, %59, %cst_28 {dimension_numbers = #tpu.dot_dimension_numbers<[1], [0], [0], [1], [0, 0, 1, 1], [], []>} : vector<16x8xf32>, vector<8x8xf32>, vector<16x8xf32> -> vector<16x8xf32>
    %73 = vector.extract_strided_slice %54 {offsets = [0, 8], sizes = [16, 8], strides = [1, 1]} : vector<16x32xf32> to vector<16x8xf32>
    %74 = vector.extract_strided_slice %57 {offsets = [0, 8], sizes = [8, 8], strides = [1, 1]} : vector<8x32xf32> to vector<8x8xf32>
    %cst_29 = arith.constant dense<0.000000e+00> : vector<16x8xf32>
    %75 = tpu.matmul %73, %74, %cst_29 {dimension_numbers = #tpu.dot_dimension_numbers<[1], [1], [0], [0], [0, 0, 1, 0], [], []>} : vector<16x8xf32>, vector<8x8xf32>, vector<16x8xf32> -> vector<16x8xf32>
    %cst_30 = arith.constant 0.353553385 : f32
    %76 = vector.broadcast %cst_30 : f32 to vector<16x8xf32>
    %77 = arith.mulf %75, %76 : vector<16x8xf32>
    %cst_31 = arith.constant dense<0xFF800000> : vector<16xf32>
    %78 = vector.multi_reduction <maximumf>, %77, %cst_31 [1] : vector<16x8xf32> to vector<16xf32>
    %79 = vector.shape_cast %78 : vector<16xf32> to vector<16x1xf32>
    %80 = vector.broadcast %79 : vector<16x1xf32> to vector<16x8xf32>
    %81 = arith.subf %77, %80 : vector<16x8xf32>
    %82 = math.exp %81 : vector<16x8xf32>
    %cst_32 = arith.constant dense<0.000000e+00> : vector<16xf32>
    %83 = vector.multi_reduction <add>, %82, %cst_32 [1] : vector<16x8xf32> to vector<16xf32>
    %84 = vector.shape_cast %83 : vector<16xf32> to vector<16x1xf32>
    %85 = vector.broadcast %84 : vector<16x1xf32> to vector<16x8xf32>
    %86 = arith.divf %82, %85 : vector<16x8xf32>
    %cst_33 = arith.constant dense<0.000000e+00> : vector<16x8xf32>
    %87 = tpu.matmul %86, %74, %cst_33 {dimension_numbers = #tpu.dot_dimension_numbers<[1], [0], [0], [1], [0, 0, 1, 1], [], []>} : vector<16x8xf32>, vector<8x8xf32>, vector<16x8xf32> -> vector<16x8xf32>
    %88 = vector.extract_strided_slice %54 {offsets = [0, 16], sizes = [16, 8], strides = [1, 1]} : vector<16x32xf32> to vector<16x8xf32>
    %89 = vector.extract_strided_slice %57 {offsets = [0, 16], sizes = [8, 8], strides = [1, 1]} : vector<8x32xf32> to vector<8x8xf32>
    %cst_34 = arith.constant dense<0.000000e+00> : vector<16x8xf32>
    %90 = tpu.matmul %88, %89, %cst_34 {dimension_numbers = #tpu.dot_dimension_numbers<[1], [1], [0], [0], [0, 0, 1, 0], [], []>} : vector<16x8xf32>, vector<8x8xf32>, vector<16x8xf32> -> vector<16x8xf32>
    %cst_35 = arith.constant 0.353553385 : f32
    %91 = vector.broadcast %cst_35 : f32 to vector<16x8xf32>
    %92 = arith.mulf %90, %91 : vector<16x8xf32>
    %cst_36 = arith.constant dense<0xFF800000> : vector<16xf32>
    %93 = vector.multi_reduction <maximumf>, %92, %cst_36 [1] : vector<16x8xf32> to vector<16xf32>
    %94 = vector.shape_cast %93 : vector<16xf32> to vector<16x1xf32>
    %95 = vector.broadcast %94 : vector<16x1xf32> to vector<16x8xf32>
    %96 = arith.subf %92, %95 : vector<16x8xf32>
    %97 = math.exp %96 : vector<16x8xf32>
    %cst_37 = arith.constant dense<0.000000e+00> : vector<16xf32>
    %98 = vector.multi_reduction <add>, %97, %cst_37 [1] : vector<16x8xf32> to vector<16xf32>
    %99 = vector.shape_cast %98 : vector<16xf32> to vector<16x1xf32>
    %100 = vector.broadcast %99 : vector<16x1xf32> to vector<16x8xf32>
    %101 = arith.divf %97, %100 : vector<16x8xf32>
    %cst_38 = arith.constant dense<0.000000e+00> : vector<16x8xf32>
    %102 = tpu.matmul %101, %89, %cst_38 {dimension_numbers = #tpu.dot_dimension_numbers<[1], [0], [0], [1], [0, 0, 1, 1], [], []>} : vector<16x8xf32>, vector<8x8xf32>, vector<16x8xf32> -> vector<16x8xf32>
    %103 = vector.extract_strided_slice %54 {offsets = [0, 24], sizes = [16, 8], strides = [1, 1]} : vector<16x32xf32> to vector<16x8xf32>
    %104 = vector.extract_strided_slice %57 {offsets = [0, 24], sizes = [8, 8], strides = [1, 1]} : vector<8x32xf32> to vector<8x8xf32>
    %cst_39 = arith.constant dense<0.000000e+00> : vector<16x8xf32>
    %105 = tpu.matmul %103, %104, %cst_39 {dimension_numbers = #tpu.dot_dimension_numbers<[1], [1], [0], [0], [0, 0, 1, 0], [], []>} : vector<16x8xf32>, vector<8x8xf32>, vector<16x8xf32> -> vector<16x8xf32>
    %cst_40 = arith.constant 0.353553385 : f32
    %106 = vector.broadcast %cst_40 : f32 to vector<16x8xf32>
    %107 = arith.mulf %105, %106 : vector<16x8xf32>
    %cst_41 = arith.constant dense<0xFF800000> : vector<16xf32>
    %108 = vector.multi_reduction <maximumf>, %107, %cst_41 [1] : vector<16x8xf32> to vector<16xf32>
    %109 = vector.shape_cast %108 : vector<16xf32> to vector<16x1xf32>
    %110 = vector.broadcast %109 : vector<16x1xf32> to vector<16x8xf32>
    %111 = arith.subf %107, %110 : vector<16x8xf32>
    %112 = math.exp %111 : vector<16x8xf32>
    %cst_42 = arith.constant dense<0.000000e+00> : vector<16xf32>
    %113 = vector.multi_reduction <add>, %112, %cst_42 [1] : vector<16x8xf32> to vector<16xf32>
    %114 = vector.shape_cast %113 : vector<16xf32> to vector<16x1xf32>
    %115 = vector.broadcast %114 : vector<16x1xf32> to vector<16x8xf32>
    %116 = arith.divf %112, %115 : vector<16x8xf32>
    %cst_43 = arith.constant dense<0.000000e+00> : vector<16x8xf32>
    %117 = tpu.matmul %116, %104, %cst_43 {dimension_numbers = #tpu.dot_dimension_numbers<[1], [0], [0], [1], [0, 0, 1, 1], [], []>} : vector<16x8xf32>, vector<8x8xf32>, vector<16x8xf32> -> vector<16x8xf32>
    %118 = tpu.concatenate %72, %87, %102, %117 in 1 : vector<16x8xf32>, vector<16x8xf32>, vector<16x8xf32>, vector<16x8xf32> -> vector<16x32xf32>
    %c0_44 = arith.constant 0 : index
    %c0_45 = arith.constant 0 : index
    %c0_46 = arith.constant 0 : index
    %119 = vector.load %arg7[%c0_44, %c0_45, %c0_46] : memref<1x16x32xf32, #tpu.memory_space<vmem>>, vector<1x16x32xf32>
    %120 = vector.shape_cast %119 : vector<1x16x32xf32> to vector<16x32xf32>
    %121 = vector.shape_cast %118 : vector<16x32xf32> to vector<1x16x32xf32>
    tpu.vector_store %arg7[%c0_44, %c0_45, %c0_46], %121 {strides = array<i32>} : memref<1x16x32xf32, #tpu.memory_space<vmem>>, vector<1x16x32xf32>,
    return
  }
  func.func @transform_0(%arg0: i32) -> (i32, i32, i32) {
    %c0_i32 = arith.constant 0 : i32
    %c0_i32_0 = arith.constant 0 : i32
    %c0_i32_1 = arith.constant 0 : i32
    return %arg0, %c0_i32, %c0_i32_0 : i32, i32, i32
  }
  func.func @transform_1(%arg0: i32) -> (i32, i32, i32) {
    %c0_i32 = arith.constant 0 : i32
    %c0_i32_0 = arith.constant 0 : i32
    %c0_i32_1 = arith.constant 0 : i32
    return %arg0, %c0_i32, %c0_i32_0 : i32, i32, i32
  }
  func.func @transform_2(%arg0: i32) -> (i32, i32) {
    %c0_i32 = arith.constant 0 : i32
    %c0_i32_0 = arith.constant 0 : i32
    %c0_i32_1 = arith.constant 0 : i32
    return %c0_i32, %c0_i32_0 : i32, i32
  }
  func.func @transform_3(%arg0: i32) -> (i32, i32) {
    %c0_i32 = arith.constant 0 : i32
    %c0_i32_0 = arith.constant 0 : i32
    %c0_i32_1 = arith.constant 0 : i32
    return %c0_i32, %c0_i32_0 : i32, i32
  }
  func.func @transform_4(%arg0: i32) -> (i32, i32) {
    %c0_i32 = arith.constant 0 : i32
    %c0_i32_0 = arith.constant 0 : i32
    %c0_i32_1 = arith.constant 0 : i32
    return %c0_i32, %c0_i32_0 : i32, i32
  }
  func.func @transform_5(%arg0: i32) -> (i32, i32) {
    %c0_i32 = arith.constant 0 : i32
    %c0_i32_0 = arith.constant 0 : i32
    %c0_i32_1 = arith.constant 0 : i32
    return %c0_i32, %c0_i32_0 : i32, i32
  }
  func.func @transform_6(%arg0: i32) -> (i32, i32, i32) {
    %c0_i32 = arith.constant 0 : i32
    %c0_i32_0 = arith.constant 0 : i32
    %c0_i32_1 = arith.constant 0 : i32
    return %arg0, %c0_i32, %c0_i32_0 : i32, i32, i32
  }
}

</mosaic_0001>

<bundles_post_ra>
// kernel: tpu_custom_call.1
= control target key start
LH: loop header
LB: loop body
LE: loop exit
PB: predicated region body
PF: predicated region fallthrough
CT: control target
= control target key end

     0   :  { %s1771_s0 = inlined_call_operand.hbm [shape: f32[2,16,32], index: 0, kind: input, shape index: {}]   ;;  %s1772_s1 = inlined_call_operand.hbm [shape: f32[2,8,32], index: 1, kind: input, shape index: {}]   ;;  %s1773_s2 = inlined_call_operand.hbm [shape: f32[32,32], index: 2, kind: input, shape index: {}]   ;;  %s1774_s3 = inlined_call_operand.vmem [shape: f32[1,32], index: 3, kind: input, shape index: {}]   ;;  %s1775_s4 = inlined_call_operand.vmem [shape: f32[1,32], index: 4, kind: input, shape index: {}]   ;;  %s1776_s5 = inlined_call_operand.vmem [shape: f32[1,32], index: 5, kind: input, shape index: {}]   ;;  %s1777_s6 = inlined_call_operand.hbm [shape: f32[2,16,32], index: 6, kind: output, shape index: {}]  }
   0x1   :  { %1784 = sst [smem:[#allocation17_spill]] %s1773_s2 }
   0x2   :  { %11 = vsyncpa [#allocation3], 0 }
   0x3   :  { %13 = vsyncpa [#allocation3 + $0x1], 0 }
   0x4   :  { %14 = vsyncpa [#allocation6], 0 }
   0x5   :  { %16 = vsyncpa [#allocation6 + $0x1], 0 }
   0x6   :  { %17 = vsyncpa [#allocation4], 0 }
   0x7   :  { %19 = vsyncpa [#allocation4 + $0x1], 0  ;;  %s1482_s21 = smov 0   ;;  %s1484_s22 = smov 0  }
   0x8   :  { %s1486_s23 = smov 0   ;;  %s1488_s24 = smov 0  }
   0x9 LB: > { %1785 = sst [smem:[#allocation13_spill]] %s1430_s23  ;;  %s1503_s25 = sadd.s32 4294967295, %s1434_s24   ;;  %s1434_s24 = sphi %s1488_s24, %s1799_s24   ;;  %s1430_s23 = sphi %s1486_s23, %s1801_s23   ;;  %s1426_s22 = sphi %s1484_s22, %s1803_s22   ;;  %s1422_s21 = sphi %s1482_s21, %s1802_s21  }
   0xa   : > { %s1102_s26 = sadd.s32 4294967294, %s1434_s24   ;;  %p45_p0 = scmp.ne.s32.totalorder %s1426_s22, %s1422_s21 }
   0xb   : > { %p46_p1 = scmp.eq.s32.totalorder %s1503_s25, 0  ;;  %p179_p2 = scmp.eq.s32.totalorder %s1503_s25, 1 }
   0xc   : > { %p185_p3 = scmp.eq.s32.totalorder %s1102_s26, 1  ;;  %p1103_p5 = scmp.ge.s32.totalorder %s1434_s24, 1 }
   0xd   : > { %p1512_p4 = por %p46_p1, %p45_p0  ;;  %p192_p7 = scmp.lt.s32.totalorder %s1434_s24, 3 }
   0xe   : > { %p1517_p6 = por %p185_p3, %p45_p0  ;;  %s1789_s2 = sld [smem:[#allocation17_spill]] }
   0xf   : > { %p1525_p8 = pnand %p1103_p5, %p192_p7  ;;  %s1436_s9 = smov [#allocation7]  }
  0x10   : > { %s1787_s28 = scalar_select %p1517_p6, 1, 0 }
  0x11   : > { %p1165_p9 = pneg %p1525_p8  ;;  %s205_s10 = sshll.u32 %s1436_s9, 4  ;;  %s206_s10 = int_to_ptr.vmem [resolvable:$true] %s205_s10 }
  0x12   : > { %1788 = sst [smem:[#allocation14_spill]] %s1787_s28  ;;  %s1535_s11 = sadd.s32 1, %s1434_s24  }
  0x13   : > { %p1166_p10 = pnand %p1165_p9, %p46_p1  ;;  %1791 = sst [smem:[#allocation15_spill]] %s1535_s11 }
  0x14   : > { %s203_s7 = sshll.u32 %s1789_s2, 4  ;;  %s1778_s12 = smov 128   ;;  %s204_s7 = int_to_ptr.hbm [resolvable:$true] %s203_s7 }
  0x15   : > { %s1779_s13 = smov 8   ;;  %s29_s14 = ssub.s32 %s1434_s24, %s1535_s11 }
  0x16   : > { %1168 = dma.hbm_to_vmem [thread:$0]  (!%p1166_p10), %s204_s7, 512, %s206_s10, [#allocation6], %s1778_s12, %s1778_s12, %s1779_s13  }
  0x17   : > { %s32_s15 = sadd.s32 1, %s1430_s23  ;;  %p30_p12 = scmp.eq.s32.totalorder %s29_s14, 0 }
  0x18   : > { %p39_p13 = scmp.ne.s32.totalorder %s1430_s23, %s1426_s22  ;;  %p40_p0 = scmp.eq.s32.totalorder %s1434_s24, 0 }
  0x19   : > { %p1181_p3 = scmp.lt.s32.totalorder %s1434_s24, 2  ;;  %s1557_s18 = sand.u32 1, %s1430_s23  }
  0x1a   : > { %s1548_s16 = scalar_select %p30_p12, %s1430_s23, %s32_s15  }
  0x1b   : > { %p41_p5 = por %p40_p0, %p39_p13  ;;  %p1552_p7 = por %p179_p2, %p39_p13 }
  0x1c   : > { %1792 = sst [smem:[#allocation16_spill]] %s1548_s16  ;;  %s1152_s19 = sshll.u32 %s1434_s24, 4 }
  0x1d   : > { %s1106_s20 = sshll.u32 %s1557_s18, 4  ;;  %s237_s30 = scalar_lea.hbm %s1771_s0, %s1152_s19 }
  0x1e   : > { %s238_s7 = sshll.u32 %s237_s30, 4  ;;  %s232_s9 = scalar_lea.vmem [#allocation2], %s1106_s20  ;;  %s239_s7 = int_to_ptr.hbm [resolvable:$true] %s238_s7 }
  0x1f   : > { %s240_s10 = sshll.u32 %s232_s9, 4  ;;  %p1566_p2 = pnand %p1181_p3, %p41_p5  ;;  %s241_s10 = int_to_ptr.vmem [resolvable:$true] %s240_s10 }
  0x20   : > { %s250_s15 = sand.u32 1, %s1434_s24   ;;  %s1109_s12 = sshll.u32 %s1557_s18, 3 }
  0x21   : > { %s229_s13 = scalar_lea.sflag [#allocation3], %s1557_s18  ;;  %s1300_s2 = sshra.s32 %s239_s7, 4  ;;  %s1301_s2 = int_to_ptr.hbm [resolvable:$true] %s1300_s2 }
  0x22   : > { %s1302_s16 = scalar_lea.hbm %s1301_s2, 16  ;;  %p1304_p10 = pneg %p1566_p2 }
  0x23   : > { %p1303_p9 = scmp.ne.s32.totalorder %s1301_s2, %s1302_s16  ;;  %s1307_s26 = scalar_lea.hbm %s1771_s0, 32 }
  0x24   : > { %p1308_p0 = scmp.lt.s32.totalorder %s1301_s2, %s1771_s0  ;;  %p1309_p3 = scmp.lt.s32.totalorder %s1307_s26, %s1302_s16 }
  0x25   : > { %p1305_p12 = pnand %p1304_p10, %p1303_p9 }
  0x26   : > { %p1310_p5 = por %p1309_p3, %p1308_p0 }
  0x27   : > { %p1306_p13 = pneg %p1305_p12 }
  0x29   : > { %p1311_p11 = pnand %p1310_p5, %p1306_p13 }
  0x2b   : > { %1314 = shalt.err (!%p1311_p11)
}
  0x2c   : > { %s1795_s18 = smov 8   ;;  %s1796_s9 = smov 128  }
  0x2d   : > { %1172 = dma.hbm_to_vmem [thread:$0]  (!%p1566_p2), %s239_s7, 256, %s241_s10, %s229_s13, %s1796_s9, %s1796_s9, %s1795_s18  }
  0x2e   : > { %s1110_s23 = sshll.u32 %s1434_s24, 3  ;;  %s254_s11 = scalar_lea.vmem [#allocation5], %s1109_s12 }
  0x2f   : > { %s262_s19 = sshll.u32 %s254_s11, 4  ;;  %s258_s29 = scalar_lea.hbm %s1772_s1, %s1110_s23  ;;  %s263_s19 = int_to_ptr.vmem [resolvable:$true] %s262_s19 }
  0x30   : > { %s260_s2 = sshll.u32 %s258_s29, 4  ;;  %s251_s16 = scalar_lea.sflag [#allocation6], %s250_s15  ;;  %s261_s2 = int_to_ptr.hbm [resolvable:$true] %s260_s2 }
  0x31   : > { %s1330_s26 = sshra.s32 %s261_s2, 4  ;;  %s1337_s11 = scalar_lea.hbm %s1772_s1, 16  ;;  %s1331_s26 = int_to_ptr.hbm [resolvable:$true] %s1330_s26 }
  0x32   : > { %s1332_s30 = scalar_lea.hbm %s1331_s26, 8  ;;  %p1338_p13 = scmp.lt.s32.totalorder %s1331_s26, %s1772_s1 }
  0x33   : > { %p1333_p11 = scmp.ne.s32.totalorder %s1331_s26, %s1332_s30  ;;  %p1339_p0 = scmp.lt.s32.totalorder %s1337_s11, %s1332_s30 }
  0x35   : > { %p1335_p9 = pnand %p1333_p11, %p1304_p10  ;;  %p1340_p3 = por %p1339_p0, %p1338_p13 }
  0x37   : > { %p1336_p12 = pneg %p1335_p9 }
  0x39   : > { %p1341_p5 = pnand %p1340_p3, %p1336_p12 }
  0x3b   : > { %1344 = shalt.err (!%p1341_p5)
}
  0x3c   : > { %1175 = dma.hbm_to_vmem [thread:$0]  (!%p1566_p2), %s261_s2, 128, %s263_s19, %s251_s16  }
  0x3d   : > { %271 = sbr.rel (%p1525_p8) target bundleno = 1566 (0x61e), region = 44  ;;  %s1607_s23 = sand.u32 (!%p1525_p8), 1, %s1426_s22  }
  0x3e   : > { %s1112_s28 = sshll.u32 (!%p1525_p8), %s1607_s23, 4  ;;  %s274_s15 = scalar_lea.sflag (!%p1525_p8), [#allocation3], %s1607_s23 }
  0x3f   : > { %s277_s18 = scalar_lea.vmem (!%p1525_p8), [#allocation2], %s1112_s28 }
  0x42   : > { %1405 = dma.done.wait (%p1512_p4), %s274_s15, 256  }
  0x43   : > { %1407 = vsyncadd (%p1512_p4), %s274_s15, 4294967040  ;;  %s283_s8 = sand.u32 1, %s1503_s25   ;;  %s1113_s14 = sshll.u32 %s1607_s23, 3 }
  0x44   : > { %s284_s9 = scalar_lea.sflag [#allocation6], %s283_s8  ;;  %s287_s19 = scalar_lea.vmem [#allocation5], %s1113_s14 }
  0x45   : > { %1409 = dma.done.wait (%p1512_p4), %s284_s9, 128  }
  0x46   : > { %1411 = vsyncadd (%p1512_p4), %s284_s9, 4294967168 }
  0x47   : > { %1413 = dma.done.wait (%p46_p1), [#allocation6], 512  }
  0x48   : > { %1415 = vsyncadd (%p46_p1), [#allocation6], 4294966784  ;;  %vm337_vm0 = vcmask 261120   ;;  %v327_v0 = vld [vmem:[%s277_s18] sm:$0xff]  ;;  %v328_v1 = vld [vmem:[%s277_s18 + $0x8] sm:$0xff]  ;;  %v1439_v6 = vmov 32.0  }
  0x49   : > { %v338_v2 = vsel %vm337_vm0, %v327_v0, 0.0  ;;  %v341_v3 = vsel %vm337_vm0, %v328_v1, 0.0  ;;  %v329_v4 = vld [vmem:[%s287_s19] sm:$0xff]  ;;  %1230 = vrcp.f32 %v1439_v6  ;;  %v331_v30 = vld [vmem:[#allocation7 + $0x8] sm:$0xff]  ;;  %v330_v31 = vld [vmem:[#allocation7] sm:$0xff]  ;;  %vm490_vm11 = vcmask 64512  }
  0x4a   : > { %339 = vadd.xlane.f32.xlu0 %v338_v2  ;;  %342 = vadd.xlane.f32.xlu1 %v341_v3  ;;  %v399_v5 = vsel %vm337_vm0, %v329_v4, 0.0  ;;  %v333_v28 = vld [vmem:[#allocation7 + $0x18] sm:$0xff]  ;;  %v332_v29 = vld [vmem:[#allocation7 + $0x10] sm:$0xff]  ;;  %s1440_s30 = smov 120   ;;  %s1441_s13 = smov 104  }
  0x4b   : > { %1116 = vmatpush.xpose.msk.msra.mxu0 %vm337_vm0, %v333_v28  ;;  %1122 = vmatpush.xpose.msk.msra.mxu1 %vm337_vm0, %v333_v28  ;;  %v1227_v49 = vld [vmem:[%s1775_s4] ss:$0 sm:$0xff]  ;;  %s1442_s7 = smov 112   ;;  %s1443_s11 = smov 8  }
  0x4c   : > { %v1228_v53 = vld [vmem:[%s1776_s5] ss:$0 sm:$0xff]  ;;  %s1444_s12 = smov 16   ;;  %s1445_s10 = smov 24  }
  0x4d   : > { %s1153_s15 = sshll.u32 %s1503_s25, 4  ;;  %s326_s18 = scalar_lea.vmem [#allocation8], %s1112_s28 }
  0x4e   : > { %s993_s9 = scalar_lea.hbm %s1777_s6, %s1153_s15  ;;  %s994_s19 = sshll.u32 %s326_s18, 4  ;;  %s995_s19 = int_to_ptr.vmem [resolvable:$true] %s994_s19 }
  0x4f   : > { %v1231_v7 = vpop.eup %1230  ;;  %1117 = vmatpush.xpose.msk.msra.mxu0 %vm337_vm0, %v332_v29  ;;  %1123 = vmatpush.xpose.msk.msra.mxu1 %vm337_vm0, %v332_v29  ;;  %s996_s25 = sshll.u32 %s993_s9, 4  ;;  %s982_s28 = scalar_lea.sflag [#allocation4], %s1607_s23  ;;  %s997_s25 = int_to_ptr.hbm [resolvable:$true] %s996_s25 }
  0x50   : > { %v345_v8 = vmul.f32 32.0, %v1231_v7  ;;  %vm349_vm1 = vweird.f32 %v1231_v7  ;;  %s1374_s27 = sshra.s32 %s997_s25, 4  ;;  %s1380_s16 = scalar_lea.hbm %s1777_s6, 32  ;;  %s1375_s27 = int_to_ptr.hbm [resolvable:$true] %s1374_s27 }
  0x51   : > { %s1376_s20 = scalar_lea.hbm %s1375_s27, 16  ;;  %p1381_p2 = scmp.lt.s32.totalorder %s1375_s27, %s1777_s6 }
  0x52   : > { %400 = vadd.xlane.f32.xlu0 %v399_v5  ;;  %v346_v9 = vsub.f32 1.0, %v345_v8  ;;  %p1377_p1 = scmp.ne.s32.totalorder %s1375_s27, %s1376_s20  ;;  %p1382_p10 = scmp.lt.s32.totalorder %s1380_s16, %s1376_s20 }
  0x53   : > { %1118 = vmatpush.xpose.msk.msra.mxu0 %vm337_vm0, %v331_v30  ;;  %1124 = vmatpush.xpose.msk.msra.mxu1 %vm337_vm0, %v331_v30 }
  0x54   : > { %v347_v10 = vmul.f32 %v1231_v7, %v346_v9  ;;  %v1229_v9 = vld [vmem:[%s1774_s3] ss:$0 sm:$0xff]  ;;  %p1378_p4 = pnand %p1377_p1, %p1552_p7  ;;  %p1383_p11 = por %p1382_p10, %p1381_p2 }
  0x56   : > { %v348_v11 = vadd.f32 %v1231_v7, %v347_v10  ;;  %p1379_p8 = pneg %p1378_p4 }
  0x57   : > { %1119 = vmatpush.xpose.msk.msra.mxu0 %vm337_vm0, %v330_v31  ;;  %1125 = vmatpush.xpose.msk.msra.mxu1 %vm337_vm0, %v330_v31 }
  0x58   : > { %v350_v12 = vsel %vm349_vm1, %v1231_v7, %v348_v11  ;;  %p1384_p9 = pnand %p1383_p11, %p1379_p8 }
  0xbd   : > { %v340_v13 = vpop.xlane.xlu0 %339  ;;  %v343_v17 = vpop.xlane.xlu1 %342 }
  0xbe   : > { %v351_v14 = vmul.f32 %v350_v12, %v340_v13  ;;  %v352_v21 = vmul.f32 %v350_v12, %v343_v17 }
  0xc0   : > { %v353_v15 = vsub.f32 %v327_v0, %v351_v14  ;;  %v1631_v23 = vsub.f32 %v328_v1, %v352_v21 }
  0xc2   : > { %v355_v16 = vmul.f32 %v353_v15, %v353_v15  ;;  %v356_v26 = vmul.f32 %v1631_v23, %v1631_v23 }
  0xc4   : > { %v357_v18 = vsel %vm337_vm0, %v355_v16, 0.0  ;;  %v360_v27 = vsel %vm337_vm0, %v356_v26, 0.0 }
  0xc5   : > { %358 = vadd.xlane.f32.xlu1 %v357_v18  ;;  %v401_v19 = vpop.xlane.xlu0 %400 }
  0xc6   : > { %v402_v20 = vmul.f32 %v401_v19, %v350_v12 }
  0xc8   : > { %v403_v22 = vsub.f32 %v329_v4, %v402_v20 }
  0xca   : > { %v404_v24 = vmul.f32 %v403_v22, %v403_v22 }
  0xcc   : > { %v405_v25 = vsel %vm337_vm0, %v404_v24, 0.0 }
  0xcd   : > { %406 = vadd.xlane.f32.xlu2 %v405_v25 }
  0xd5   : > { %361 = vadd.xlane.f32.xlu2 %v360_v27 }
 0x138   : > { %v359_v32 = vpop.xlane.xlu1 %358 }
 0x139   : > { %v363_v33 = vmul.f32 %v359_v32, %v350_v12 }
 0x13b   : > { %v365_v34 = vadd.f32 1e-05, %v363_v33 }
 0x13d   : > { %1232 = vrsqrt.f32 %v365_v34  ;;  %vm373_vm3 = vweird.f32 %v365_v34 }
 0x140   : > { %v407_v35 = vpop.xlane.xlu2 %406 }
 0x141   : > { %v408_v36 = vmul.f32 %v407_v35, %v350_v12 }
 0x143   : > { %v1233_v37 = vpop.eup %1232  ;;  %v409_v38 = vadd.f32 1e-05, %v408_v36 }
 0x144   : > { %v368_v39 = vmul.f32 %v1233_v37, %v365_v34  ;;  %vm374_vm2 = vweird.f32 %v1233_v37 }
 0x145   : > { %1234 = vrsqrt.f32 %v409_v38  ;;  %vm375_vm4 = vmor %vm373_vm3, %vm374_vm2  ;;  %vm416_vm6 = vweird.f32 %v409_v38 }
 0x146   : > { %v369_v40 = vmul.f32 %v1233_v37, %v368_v39 }
 0x148   : > { %v370_v41 = vmul.f32 0.5, %v369_v40  ;;  %v362_v42 = vpop.xlane.xlu2 %361 }
 0x149   : > { %v364_v43 = vmul.f32 %v362_v42, %v350_v12 }
 0x14a   : > { %v371_v44 = vsub.f32 1.5, %v370_v41 }
 0x14b   : > { %v1235_v45 = vpop.eup %1234  ;;  %v366_v46 = vadd.f32 1e-05, %v364_v43 }
 0x14c   : > { %v372_v47 = vmul.f32 %v1233_v37, %v371_v44  ;;  %v411_v48 = vmul.f32 %v1235_v45, %v409_v38  ;;  %vm417_vm5 = vweird.f32 %v1235_v45 }
 0x14d   : > { %1236 = vrsqrt.f32 %v366_v46  ;;  %vm418_vm7 = vmor %vm416_vm6, %vm417_vm5  ;;  %vm383_vm9 = vweird.f32 %v366_v46 }
 0x14e   : > { %v376_v50 = vsel %vm375_vm4, %v1233_v37, %v372_v47  ;;  %v412_v51 = vmul.f32 %v1235_v45, %v411_v48 }
 0x14f   : > { %v387_v52 = vmul.f32 %v376_v50, %v353_v15 }
 0x150   : > { %v413_v54 = vmul.f32 0.5, %v412_v51 }
 0x151   : > { %v392_v55 = vmul.f32 %v1227_v49, %v387_v52 }
 0x152   : > { %v414_v56 = vsub.f32 1.5, %v413_v54 }
 0x153   : > { %v1237_v57 = vpop.eup %1236  ;;  %v397_v58 = vadd.f32 %v1228_v53, %v392_v55 }
 0x154   : > { %v415_v59 = vmul.f32 %v1235_v45, %v414_v56  ;;  %v378_v60 = vmul.f32 %v1237_v57, %v366_v46  ;;  %vm384_vm8 = vweird.f32 %v1237_v57 }
 0x155   : > { %1120 = vmatmul.msk.f32.vlgmr.msra.gmra.mxu0 %vm337_vm0, %v397_v58  ;;  %vm385_vm10 = vmor %vm383_vm9, %vm384_vm8 }
 0x156   : > { %v419_v61 = vsel %vm418_vm7, %v1235_v45, %v415_v59  ;;  %v379_v62 = vmul.f32 %v1237_v57, %v378_v60 }
 0x157   : > { %v420_v63 = vmul.f32 %v419_v61, %v403_v22 }
 0x158   : > { %v380_v0 = vmul.f32 0.5, %v379_v62 }
 0x159   : > { %v421_v1 = vmul.f32 %v1227_v49, %v420_v63 }
 0x15a   : > { %v381_v2 = vsub.f32 1.5, %v380_v0 }
 0x15b   : > { %v422_v3 = vadd.f32 %v1228_v53, %v421_v1 }
 0x15c   : > { %v382_v4 = vmul.f32 %v1237_v57, %v381_v2 }
 0x15d   : > { %1126 = vmatmul.msk.f32.vlgmr.msra.gmra.mxu1 %vm337_vm0, %v422_v3 }
 0x15e   : > { %v386_v5 = vsel %vm385_vm10, %v1237_v57, %v382_v4 }
 0x15f   : > { %v388_v6 = vmul.f32 %v386_v5, %v1631_v23 }
 0x161   : > { %v393_v7 = vmul.f32 %v1227_v49, %v388_v6 }
 0x163   : > { %v398_v8 = vadd.f32 %v1228_v53, %v393_v7 }
 0x165   : > { %1121 = vmatmul.msk.f32.gmra.mxu0 %vm337_vm0, %v398_v8 }
 0x1d2   : > { %v461_v10 = vpop.f32.mrf.mxu0 }
 0x1d3   : > { %v462_v13 = vadd.f32 %v1229_v9, %v461_v10 }
 0x1da   : > { %v487_v11 = vpop.f32.mrf.mxu1 }
 0x1db   : > { %v488_v12 = vadd.f32 %v1229_v9, %v487_v11 }
 0x1dd   : > { %1127 = vmatpush.xpose.msk.msrb.mxu1 %vm490_vm11, %v488_v12  ;;  %1154 = vmatpush.xpose.msk.msra.mxu2 %vm490_vm11, %v488_v12 }
 0x1de   : > { %594 = vmatpush.msra.mxu3 %v488_v12 }
 0x1e0   : > { %1128 = vmatmul.msk.f32.vlgmr.msrb.gmra.mxu1 %vm490_vm11, %v462_v13 }
 0x1e2   : > { %v464_v14 = vpop.f32.mrf.mxu0 }
 0x1e3   : > { %v465_v15 = vadd.f32 %v1229_v9, %v464_v14 }
 0x1e5   : > { %1129 = vmatmul.msk.f32.vlgmr.msra.gmra.mxu2 %vm490_vm11, %v465_v15 }
 0x25d   : > { %v517_v16 = vpop.f32.mrf.mxu1 }
 0x25e   : > { %v523_v17 = vmul.f32 0.35355338, %v517_v16 }
 0x260   : > { %v525_v18 = vsel %vm490_vm11, %v523_v17, -inf }
 0x261   : > { %526 = vmax.xlane.f32.xlu0 %v525_v18 }
 0x268   : > { %v520_v19 = vpop.f32.mrf.mxu2 }
 0x269   : > { %v524_v20 = vmul.f32 0.35355338, %v520_v19 }
 0x26b   : > { %v528_v21 = vsel %vm490_vm11, %v524_v20, -inf }
 0x26c   : > { %529 = vmax.xlane.f32.xlu1 %v528_v21 }
 0x285   : > { %606 = vrot.lane.b32.xlu1 %v488_v12, %s1440_s30 }
 0x28d   : > { %832 = vrot.lane.b32.xlu1 %v462_v13, %s1441_s13 }
 0x295   : > { %717 = vrot.lane.b32.xlu1 %v462_v13, %s1442_s7 }
 0x2d4   : > { %v527_v22 = vpop.xlane.xlu0 %526 }
 0x2d5   : > { %v531_v23 = vsub.f32 %v523_v17, %v527_v22 }
 0x2d7   : > { %v533_v24 = vmul.f32 1.442695, %v531_v23 }
 0x2d9   : > { %1238 = vpow2.f32 %v533_v24 }
 0x2df   : > { %v1239_v25 = vpop.eup %1238  ;;  %v530_v26 = vpop.xlane.xlu1 %529 }
 0x2e0   : > { %v532_v27 = vsub.f32 %v524_v20, %v530_v26  ;;  %v537_v28 = vsel %vm490_vm11, %v1239_v25, 0.0 }
 0x2e1   : > { %538 = vadd.xlane.f32.xlu2 %v537_v28 }
 0x2e2   : > { %v535_v29 = vmul.f32 1.442695, %v532_v27 }
 0x2e4   : > { %1240 = vpow2.f32 %v535_v29 }
 0x2ea   : > { %v1241_v30 = vpop.eup %1240 }
 0x2eb   : > { %v540_v31 = vsel %vm490_vm11, %v1241_v30, 0.0 }
 0x2ec   : > { %541 = vadd.xlane.f32.xlu0 %v540_v31 }
 0x2f7   : > { %v607_v32 = vpop.permute.xlu1 %606 }
 0x2f8   : > { %1132 = vmatpush.xpose.msk.msrb.mxu3 %vm490_vm11, %v607_v32  ;;  %709 = vmatpush.msrb.mxu2 %v607_v32 }
 0x2f9   : > { %602 = vrot.lane.b32.xlu2 %v462_v13, %s1440_s30 }
 0x2ff   : > { %v833_v60 = vpop.permute.xlu1 %832 }
 0x300   : > { %604 = vrot.lane.b32.xlu0 %v465_v15, %s1440_s30 }
 0x301   : > { %836 = vrot.lane.b32.xlu2 %v488_v12, %s1441_s13 }
 0x307   : > { %v718_v62 = vpop.permute.xlu1 %717 }
 0x308   : > { %721 = vrot.lane.b32.xlu0 %v488_v12, %s1442_s7 }
 0x309   : > { %834 = vrot.lane.b32.xlu2 %v465_v15, %s1441_s13 }
 0x310   : > { %719 = vrot.lane.b32.xlu0 %v465_v15, %s1442_s7 }
 0x354   : > { %v539_v33 = vpop.xlane.xlu2 %538 }
 0x355   : > { %1242 = vrcp.f32 %v539_v33  ;;  %v554_v38 = vand.u32 2147483648, %v539_v33  ;;  %v552_v41 = vand.u32 2147483647, %v539_v33  ;;  %vm548_vm13 = vweird.f32 %v539_v33 }
 0x357   : > { %v555_v43 = vor.u32 1.1754944e-38, %v554_v38  ;;  %vm553_vm15 = vcmp.eq.f32.partialorder %v552_v41, 8.507059e+37 }
 0x35b   : > { %v1243_v34 = vpop.eup %1242 }
 0x35c   : > { %v544_v35 = vmul.f32 %v1243_v34, %v539_v33  ;;  %v603_v36 = vpop.permute.xlu2 %602  ;;  %vm549_vm12 = vweird.f32 %v1243_v34 }
 0x35d   : > { %vm550_vm14 = vmor %vm548_vm13, %vm549_vm12 }
 0x35e   : > { %v545_v37 = vsub.f32 1.0, %v544_v35 }
 0x35f   : > { %v542_v39 = vpop.xlane.xlu0 %541 }
 0x360   : > { %v546_v40 = vmul.f32 %v1243_v34, %v545_v37  ;;  %1244 = vrcp.f32 %v542_v39  ;;  %v569_v51 = vand.u32 2147483648, %v542_v39  ;;  %v567_v53 = vand.u32 2147483647, %v542_v39 }
 0x361   : > { %vm563_vm2 = vweird.f32 %v542_v39 }
 0x362   : > { %v547_v42 = vadd.f32 %v1243_v34, %v546_v40  ;;  %v570_v55 = vor.u32 1.1754944e-38, %v569_v51  ;;  %vm568_vm4 = vcmp.eq.f32.partialorder %v567_v53, 8.507059e+37 }
 0x364   : > { %v837_v44 = vpop.permute.xlu2 %836  ;;  %v551_v45 = vsel %vm550_vm14, %v1243_v34, %v547_v42 }
 0x365   : > { %939 = vmatpush.msra.mxu2 %v837_v44  ;;  %v556_v46 = vsel %vm553_vm15, %v555_v43, %v551_v45 }
 0x366   : > { %v1245_v47 = vpop.eup %1244  ;;  %v557_v48 = vmul.f32 %v1239_v25, %v556_v46 }
 0x367   : > { %v559_v49 = vmul.f32 %v1245_v47, %v542_v39  ;;  %vm564_vm1 = vweird.f32 %v1245_v47 }
 0x368   : > { %1130 = vmatmul.msk.f32.vlgmr.msra.gmra.mxu3 %vm490_vm11, %v557_v48  ;;  %vm565_vm3 = vmor %vm563_vm2, %vm564_vm1 }
 0x369   : > { %v560_v50 = vsub.f32 1.0, %v559_v49  ;;  %1142 = vmatpush.xpose.msk.msra.mxu3 %vm490_vm11, %v837_v44 }
 0x36b   : > { %v561_v52 = vmul.f32 %v1245_v47, %v560_v50 }
 0x36c   : > { %v835_v0 = vpop.permute.xlu2 %834 }
 0x36d   : > { %v562_v54 = vadd.f32 %v1245_v47, %v561_v52 }
 0x36f   : > { %v566_v56 = vsel %vm565_vm3, %v1245_v47, %v562_v54 }
 0x370   : > { %v571_v57 = vsel %vm568_vm4, %v570_v55, %v566_v56 }
 0x371   : > { %v572_v58 = vmul.f32 %v1241_v30, %v571_v57 }
 0x372   : > { %v605_v59 = vpop.permute.xlu0 %604 }
 0x373   : > { %1131 = vmatmul.msk.f32.gmra.mxu3 %vm490_vm11, %v572_v58 }
 0x37a   : > { %v722_v61 = vpop.permute.xlu0 %721 }
 0x37b   : > { %1133 = vmatmul.msk.f32.vlgmr.msrb.gmra.mxu3 %vm490_vm11, %v603_v36  ;;  %1137 = vmatpush.xpose.msk.msra.mxu1 %vm490_vm11, %v722_v61 }
 0x37c   : > { %824 = vmatpush.msrb.mxu0 %v722_v61 }
 0x37e   : > { %1138 = vmatmul.msk.f32.vlgmr.msra.gmra.mxu1 %vm490_vm11, %v718_v62 }
 0x382   : > { %v720_v63 = vpop.permute.xlu0 %719 }
 0x383   : > { %1134 = vmatmul.msk.f32.gmra.mxu3 %vm490_vm11, %v605_v59 }
 0x386   : > { %1139 = vmatmul.msk.f32.gmra.mxu1 %vm490_vm11, %v720_v63 }
 0x38b   : > { %1143 = vmatmul.msk.f32.vlgmr.msra.gmra.mxu3 %vm490_vm11, %v833_v60 }
 0x393   : > { %1144 = vmatmul.msk.f32.gmra.mxu3 %vm490_vm11, %v835_v0 }
 0x3eb   : > { %v1677_v1 = vpop.f32.mrf.mxu3 }
 0x3f6   : > { %v1679_v2 = vpop.f32.mrf.mxu3 }
 0x3fb   : > { %v746_v6 = vpop.f32.mrf.mxu1 }
 0x3fc   : > { %v752_v7 = vmul.f32 0.35355338, %v746_v6 }
 0x3fe   : > { %v631_v3 = vpop.f32.mrf.mxu3  ;;  %v754_v10 = vsel %vm490_vm11, %v752_v7, -inf }
 0x3ff   : > { %v637_v4 = vmul.f32 0.35355338, %v631_v3 }
 0x401   : > { %v639_v5 = vsel %vm490_vm11, %v637_v4, -inf }
 0x402   : > { %640 = vmax.xlane.f32.xlu2 %v639_v5 }
 0x403   : > { %v749_v15 = vpop.f32.mrf.mxu1 }
 0x404   : > { %v753_v16 = vmul.f32 0.35355338, %v749_v15 }
 0x406   : > { %v634_v8 = vpop.f32.mrf.mxu3  ;;  %v757_v19 = vsel %vm490_vm11, %v753_v16, -inf }
 0x407   : > { %v638_v9 = vmul.f32 0.35355338, %v634_v8 }
 0x409   : > { %v642_v11 = vsel %vm490_vm11, %v638_v9, -inf }
 0x40a   : > { %755 = vmax.xlane.f32.xlu2 %v754_v10  ;;  %643 = vmax.xlane.f32.xlu1 %v642_v11 }
 0x40e   : > { %v861_v12 = vpop.f32.mrf.mxu3 }
 0x40f   : > { %v867_v13 = vmul.f32 0.35355338, %v861_v12 }
 0x411   : > { %v869_v14 = vsel %vm490_vm11, %v867_v13, -inf }
 0x412   : > { %870 = vmax.xlane.f32.xlu0 %v869_v14 }
 0x416   : > { %v864_v17 = vpop.f32.mrf.mxu3 }
 0x417   : > { %v868_v18 = vmul.f32 0.35355338, %v864_v17 }
 0x419   : > { %v872_v20 = vsel %vm490_vm11, %v868_v18, -inf }
 0x41a   : > { %758 = vmax.xlane.f32.xlu0 %v757_v19  ;;  %873 = vmax.xlane.f32.xlu1 %v872_v20 }
 0x475   : > { %v641_v21 = vpop.xlane.xlu2 %640 }
 0x476   : > { %v645_v22 = vsub.f32 %v637_v4, %v641_v21 }
 0x478   : > { %v647_v23 = vmul.f32 1.442695, %v645_v22 }
 0x47a   : > { %1246 = vpow2.f32 %v647_v23 }
 0x47d   : > { %v644_v24 = vpop.xlane.xlu1 %643  ;;  %v756_v25 = vpop.xlane.xlu2 %755 }
 0x47e   : > { %v646_v26 = vsub.f32 %v638_v9, %v644_v24  ;;  %v760_v27 = vsub.f32 %v752_v7, %v756_v25 }
 0x480   : > { %v1687_v28 = vpop.eup %1246  ;;  %v649_v29 = vmul.f32 1.442695, %v646_v26  ;;  %v762_v30 = vmul.f32 1.442695, %v760_v27 }
 0x481   : > { %v651_v31 = vsel %vm490_vm11, %v1687_v28, 0.0 }
 0x482   : > { %1248 = vpow2.f32 %v649_v29  ;;  %652 = vadd.xlane.f32.xlu2 %v651_v31 }
 0x483   : > { %1250 = vpow2.f32 %v762_v30 }
 0x485   : > { %v871_v32 = vpop.xlane.xlu0 %870 }
 0x486   : > { %v875_v33 = vsub.f32 %v867_v13, %v871_v32 }
 0x488   : > { %v1691_v34 = vpop.eup %1248  ;;  %v877_v35 = vmul.f32 1.442695, %v875_v33 }
 0x489   : > { %v1693_v36 = vpop.eup %1250  ;;  %v654_v37 = vsel %vm490_vm11, %v1691_v34, 0.0 }
 0x48a   : > { %1252 = vpow2.f32 %v877_v35  ;;  %655 = vadd.xlane.f32.xlu1 %v654_v37  ;;  %v766_v38 = vsel %vm490_vm11, %v1693_v36, 0.0 }
 0x48b   : > { %767 = vadd.xlane.f32.xlu2 %v766_v38 }
 0x48d   : > { %v759_v39 = vpop.xlane.xlu0 %758  ;;  %v874_v40 = vpop.xlane.xlu1 %873 }
 0x48e   : > { %v761_v41 = vsub.f32 %v753_v16, %v759_v39  ;;  %v876_v42 = vsub.f32 %v868_v18, %v874_v40 }
 0x490   : > { %v1699_v43 = vpop.eup %1252  ;;  %v764_v44 = vmul.f32 1.442695, %v761_v41  ;;  %v879_v45 = vmul.f32 1.442695, %v876_v42 }
 0x491   : > { %v881_v46 = vsel %vm490_vm11, %v1699_v43, 0.0 }
 0x492   : > { %1254 = vpow2.f32 %v764_v44  ;;  %882 = vadd.xlane.f32.xlu0 %v881_v46 }
 0x493   : > { %1256 = vpow2.f32 %v879_v45 }
 0x498   : > { %v1703_v47 = vpop.eup %1254 }
 0x499   : > { %v1705_v48 = vpop.eup %1256  ;;  %v769_v49 = vsel %vm490_vm11, %v1703_v47, 0.0 }
 0x49a   : > { %770 = vadd.xlane.f32.xlu0 %v769_v49  ;;  %v884_v50 = vsel %vm490_vm11, %v1705_v48, 0.0 }
 0x49b   : > { %885 = vadd.xlane.f32.xlu1 %v884_v50 }
 0x4f5   : > { %v653_v51 = vpop.xlane.xlu2 %652 }
 0x4f6   : > { %1258 = vrcp.f32 %v653_v51  ;;  %v668_v58 = vand.u32 2147483648, %v653_v51  ;;  %v666_v59 = vand.u32 2147483647, %v653_v51  ;;  %vm662_vm6 = vweird.f32 %v653_v51 }
 0x4f8   : > { %v669_v63 = vor.u32 1.1754944e-38, %v668_v58  ;;  %vm667_vm8 = vcmp.eq.f32.partialorder %v666_v59, 8.507059e+37 }
 0x4fc   : > { %v1259_v52 = vpop.eup %1258 }
 0x4fd   : > { %v658_v53 = vmul.f32 %v1259_v52, %v653_v51  ;;  %v656_v54 = vpop.xlane.xlu1 %655  ;;  %vm663_vm5 = vweird.f32 %v1259_v52 }
 0x4fe   : > { %1260 = vrcp.f32 %v656_v54  ;;  %v768_v55 = vpop.xlane.xlu2 %767  ;;  %vm664_vm7 = vmor %vm662_vm6, %vm663_vm5  ;;  %v683_v8 = vand.u32 2147483648, %v656_v54  ;;  %v681_v12 = vand.u32 2147483647, %v656_v54  ;;  %vm677_vm10 = vweird.f32 %v656_v54 }
 0x4ff   : > { %v659_v56 = vsub.f32 1.0, %v658_v53  ;;  %1262 = vrcp.f32 %v768_v55  ;;  %v783_v14 = vand.u32 2147483648, %v768_v55  ;;  %v781_v19 = vand.u32 2147483647, %v768_v55 }
 0x500   : > { %v684_v17 = vor.u32 1.1754944e-38, %v683_v8  ;;  %vm682_vm14 = vcmp.eq.f32.partialorder %v681_v12, 8.507059e+37  ;;  %vm777_vm15 = vweird.f32 %v768_v55 }
 0x501   : > { %v660_v57 = vmul.f32 %v1259_v52, %v659_v56  ;;  %v784_v25 = vor.u32 1.1754944e-38, %v783_v14  ;;  %vm782_vm2 = vcmp.eq.f32.partialorder %v781_v19, 8.507059e+37 }
 0x503   : > { %v661_v60 = vadd.f32 %v1259_v52, %v660_v57 }
 0x504   : > { %v1261_v61 = vpop.eup %1260 }
 0x505   : > { %v1263_v62 = vpop.eup %1262  ;;  %v673_v0 = vmul.f32 %v1261_v61, %v656_v54  ;;  %v883_v3 = vpop.xlane.xlu0 %882  ;;  %v665_v4 = vsel %vm664_vm7, %v1259_v52, %v661_v60  ;;  %vm678_vm9 = vweird.f32 %v1261_v61 }
 0x506   : > { %v773_v5 = vmul.f32 %v1263_v62, %v768_v55  ;;  %1264 = vrcp.f32 %v883_v3  ;;  %v670_v7 = vsel %vm667_vm8, %v669_v63, %v665_v4  ;;  %vm778_vm12 = vweird.f32 %v1263_v62  ;;  %vm679_vm13 = vmor %vm677_vm10, %vm678_vm9 }
 0x507   : > { %v674_v6 = vsub.f32 1.0, %v673_v0  ;;  %v671_v10 = vmul.f32 %v1687_v28, %v670_v7  ;;  %vm779_vm1 = vmor %vm777_vm15, %vm778_vm12  ;;  %v898_v27 = vand.u32 2147483648, %v883_v3  ;;  %v896_v31 = vand.u32 2147483647, %v883_v3 }
 0x508   : > { %v774_v9 = vsub.f32 1.0, %v773_v5  ;;  %vm892_vm4 = vweird.f32 %v883_v3 }
 0x509   : > { %v675_v11 = vmul.f32 %v1261_v61, %v674_v6  ;;  %1135 = vmatmul.msk.f32.vlgmr.msrb.gmra.mxu2 %vm490_vm11, %v671_v10  ;;  %v899_v38 = vor.u32 1.1754944e-38, %v898_v27  ;;  %vm897_vm6 = vcmp.eq.f32.partialorder %v896_v31, 8.507059e+37 }
 0x50a   : > { %v775_v13 = vmul.f32 %v1263_v62, %v774_v9 }
 0x50b   : > { %v676_v15 = vadd.f32 %v1261_v61, %v675_v11 }
 0x50c   : > { %v1265_v16 = vpop.eup %1264  ;;  %v776_v18 = vadd.f32 %v1263_v62, %v775_v13 }
 0x50d   : > { %v888_v20 = vmul.f32 %v1265_v16, %v883_v3  ;;  %v771_v21 = vpop.xlane.xlu0 %770  ;;  %v680_v22 = vsel %vm679_vm13, %v1261_v61, %v676_v15  ;;  %vm893_vm3 = vweird.f32 %v1265_v16 }
 0x50e   : > { %1266 = vrcp.f32 %v771_v21  ;;  %v886_v23 = vpop.xlane.xlu1 %885  ;;  %v685_v24 = vsel %vm682_vm14, %v684_v17, %v680_v22  ;;  %v780_v29 = vsel %vm779_vm1, %v1263_v62, %v776_v18  ;;  %vm894_vm5 = vmor %vm892_vm4, %vm893_vm3  ;;  %v798_v46 = vand.u32 2147483648, %v771_v21 }
 0x50f   : > { %v889_v26 = vsub.f32 1.0, %v888_v20  ;;  %1268 = vrcp.f32 %v886_v23  ;;  %v686_v28 = vmul.f32 %v1691_v34, %v685_v24  ;;  %v785_v32 = vsel %vm782_vm2, %v784_v25, %v780_v29 }
 0x510   : > { %v786_v33 = vmul.f32 %v1693_v36, %v785_v32  ;;  %v913_v36 = vand.u32 2147483648, %v886_v23  ;;  %v796_v51 = vand.u32 2147483647, %v771_v21  ;;  %v911_v53 = vand.u32 2147483647, %v886_v23 }
 0x511   : > { %v890_v30 = vmul.f32 %v1265_v16, %v889_v26  ;;  %1136 = vmatmul.msk.f32.gmra.mxu2 %vm490_vm11, %v686_v28  ;;  %vm792_vm9 = vweird.f32 %v771_v21  ;;  %v799_v55 = vor.u32 1.1754944e-38, %v798_v46  ;;  %vm907_vm10 = vweird.f32 %v886_v23 }
 0x512   : > { %1140 = vmatmul.msk.f32.vlgmr.msrb.gmra.mxu0 %vm490_vm11, %v786_v33  ;;  %v914_v57 = vor.u32 1.1754944e-38, %v913_v36  ;;  %vm797_vm13 = vcmp.eq.f32.partialorder %v796_v51, 8.507059e+37  ;;  %vm912_vm15 = vcmp.eq.f32.partialorder %v911_v53, 8.507059e+37  ;;  %vm973_vm1 = vcmask 130048  }
 0x513   : > { %v891_v35 = vadd.f32 %v1265_v16, %v890_v30  ;;  %vm976_vm2 = vcmask 195584  }
 0x514   : > { %v1267_v37 = vpop.eup %1266 }
 0x515   : > { %v1269_v39 = vpop.eup %1268  ;;  %v895_v40 = vsel %vm894_vm5, %v1265_v16, %v891_v35  ;;  %v788_v34 = vmul.f32 %v1267_v37, %v771_v21  ;;  %vm793_vm7 = vweird.f32 %v1267_v37 }
 0x516   : > { %v900_v41 = vsel %vm897_vm6, %v899_v38, %v895_v40  ;;  %v903_v42 = vmul.f32 %v1269_v39, %v886_v23  ;;  %vm908_vm8 = vweird.f32 %v1269_v39  ;;  %vm794_vm12 = vmor %vm792_vm9, %vm793_vm7 }
 0x517   : > { %v789_v44 = vsub.f32 1.0, %v788_v34  ;;  %v901_v45 = vmul.f32 %v1699_v43, %v900_v41  ;;  %vm909_vm14 = vmor %vm907_vm10, %vm908_vm8 }
 0x518   : > { %v904_v49 = vsub.f32 1.0, %v903_v42 }
 0x519   : > { %v790_v50 = vmul.f32 %v1267_v37, %v789_v44  ;;  %1145 = vmatmul.msk.f32.vlgmr.msra.gmra.mxu2 %vm490_vm11, %v901_v45 }
 0x51a   : > { %v905_v52 = vmul.f32 %v1269_v39, %v904_v49 }
 0x51b   : > { %v791_v54 = vadd.f32 %v1267_v37, %v790_v50 }
 0x51c   : > { %v906_v56 = vadd.f32 %v1269_v39, %v905_v52 }
 0x51d   : > { %v795_v58 = vsel %vm794_vm12, %v1267_v37, %v791_v54 }
 0x51e   : > { %v800_v43 = vsel %vm797_vm13, %v799_v55, %v795_v58  ;;  %v910_v59 = vsel %vm909_vm14, %v1269_v39, %v906_v56 }
 0x51f   : > { %v801_v60 = vmul.f32 %v1703_v47, %v800_v43  ;;  %v915_v61 = vsel %vm912_vm15, %v914_v57, %v910_v59 }
 0x520   : > { %v916_v62 = vmul.f32 %v1705_v48, %v915_v61 }
 0x521   : > { %1141 = vmatmul.msk.f32.gmra.mxu0 %vm490_vm11, %v801_v60 }
 0x522   : > { %1146 = vmatmul.msk.f32.gmra.mxu2 %vm490_vm11, %v916_v62 }
 0x58c   : > { %v711_v63 = vpop.f32.mrf.mxu2 }
 0x58d   : > { %949 = vrot.lane.b32.xlu2 %v711_v63, %s1443_s11 }
 0x58f   : > { %v826_v0 = vpop.f32.mrf.mxu0 }
 0x590   : > { %957 = vrot.lane.b32.xlu0 %v826_v0, %s1444_s12 }
 0x594   : > { %v714_v3 = vpop.f32.mrf.mxu2 }
 0x595   : > { %951 = vrot.lane.b32.xlu1 %v714_v3, %s1443_s11 }
 0x59c   : > { %v941_v4 = vpop.f32.mrf.mxu2 }
 0x59d   : > { %965 = vrot.lane.b32.xlu0 %v941_v4, %s1445_s10 }
 0x59e   : > { %v829_v47 = vpop.f32.mrf.mxu0 }
 0x59f   : > { %959 = vrot.lane.b32.xlu2 %v829_v47, %s1444_s12 }
 0x5a5   : > { %v944_v48 = vpop.f32.mrf.mxu2 }
 0x5a6   : > { %967 = vrot.lane.b32.xlu1 %v944_v48, %s1445_s10 }
 0x5e7   : > { %v950_v6 = vpop.permute.xlu2 %949 }
 0x5e8   : > { %v971_v7 = vsel %vm490_vm11, %v1677_v1, %v950_v6 }
 0x5f9   : > { %v960_v12 = vpop.permute.xlu2 %959 }
 0x602   : > { %v958_v5 = vpop.permute.xlu0 %957 }
 0x603   : > { %v974_v8 = vsel %vm973_vm1, %v971_v7, %v958_v5 }
 0x607   : > { %v952_v9 = vpop.permute.xlu1 %951 }
 0x608   : > { %v972_v1 = vsel %vm490_vm11, %v1679_v2, %v952_v9 }
 0x609   : > { %v975_v14 = vsel %vm973_vm1, %v972_v1, %v960_v12 }
 0x60f   : > { %v966_v10 = vpop.permute.xlu0 %965 }
 0x610   : > { %v977_v11 = vsel %vm976_vm2, %v974_v8, %v966_v10 }
 0x611   : > { %979 = vst.msk [vmem:[%s326_s18] sm:$0xff] %vm337_vm0, %v977_v11 }
 0x618   : > { %v968_v13 = vpop.permute.xlu1 %967 }
 0x619   : > { %v978_v15 = vsel %vm976_vm2, %v975_v14, %v968_v13 }
 0x61a   : > { %980 = vst.msk [vmem:[%s326_s18 + $0x8] sm:$0xff] %vm337_vm0, %v978_v15 }
 0x61b   : > { %1387 = shalt.err (!%p1384_p9)
}
 0x61c   : > { %s1446_s23 = smov 128  }
 0x61d   : > { %1163 = dma.vmem_to_hbm [thread:$0]  (%p1552_p7), %s995_s19, 256, %s997_s25, %s982_s28, %s1446_s23, %s1446_s23, %s1443_s11  }
 0x61e PF: > { %s1011_s7 = sand.u32 1, %s1422_s21   ;;  %p1798_p12 = scmp.ge.s32.totalorder %s1434_s24, 2 }
 0x61f   : > { %s1012_s12 = scalar_lea.sflag [#allocation4], %s1011_s7 }
 0x620   : > { %p1177_p13 = pnand %p1798_p12, %p1517_p6 }
 0x622   : > { %p1178_p0 = pneg %p1177_p13 }
 0x624   : > { %1417 = dma.done.wait (%p1178_p0), %s1012_s12, 256  }
 0x625   : > { %1419 = vsyncadd (%p1178_p0), %s1012_s12, 4294967040  ;;  %s1799_s24 = sld [smem:[#allocation15_spill]]  ;;  %s1802_s21 = smov %s1426_s22 }
 0x626   : > { %s1800_s10 = sld [smem:[#allocation13_spill]] }
 0x627   : > { %s1801_s23 = sld [smem:[#allocation16_spill]] }
 0x62b   : > { %p22_p3 = scmp.ge.s32.totalorder %s1799_s24, 4  }
 0x62c   : > { %s1803_s22 = smov %s1800_s10 }
 0x62d   :  { %24 = sbr.rel (!%p22_p3) target bundleno = 9 (0x9), region = 106 }
 0x632   :  { %1018 = vsyncpa [#allocation3], 1 }
 0x633   :  { %1020 = vsyncpa [#allocation3 + $0x1], 1 }
 0x634   :  { %1021 = vsyncpa [#allocation6], 1 }
 0x635   :  { %1023 = vsyncpa [#allocation6 + $0x1], 1 }
 0x636   :  { %1024 = vsyncpa [#allocation4], 1 }
 0x637   :  { %1026 = vsyncpa [#allocation4 + $0x1], 1 }

</bundles_post_ra>
